<compile_context>
chip_gen: v7x
topology: tpu7x:2x2x1
jax: 0.10.0
libtpu: 0.0.40
codegen_flags: <defaults>
</compile_context>

<pallas_src>
import functools

import jax
import jax.numpy as jnp
from jax.experimental import pallas as pl
from jax.experimental.pallas import tpu as pltpu

EPS = 1e-5        # nn.BatchNorm2d default eps
TM = 512          # GEMM row tile (and M padding unit)
TM_BN = 512       # BN/act row tile
MAX_TK = 1024     # K tile


def _round_up(x, m):
    return (x + m - 1) // m * m


# ----------------------------------------------------------------------------
# Kernel 1: conv-as-GEMM (bf16 operands, f32 accumulator) + fused per-channel
# sum / sum-of-squares for training-mode BatchNorm.
# Grid = (group, M-tile, K-tile); K (reduction) is the innermost axis.
# ----------------------------------------------------------------------------
def _conv_stats_kernel(p_ref, w_ref, o_ref, sum_ref, sq_ref, acc_ref):
    g = pl.program_id(0)
    i = pl.program_id(1)
    k = pl.program_id(2)
    nk = pl.num_programs(2)

    @pl.when(k == 0)
    def _():
        acc_ref[...] = jnp.zeros_like(acc_ref)

    acc_ref[...] += jnp.dot(p_ref[...], w_ref[...],
                            preferred_element_type=jnp.float32)

    @pl.when((g == 0) & (i == 0) & (k == 0))
    def _():
        sum_ref[...] = jnp.zeros_like(sum_ref)
        sq_ref[...] = jnp.zeros_like(sq_ref)

    @pl.when(k == nk - 1)
    def _():
        acc = acc_ref[...]
        o_ref[...] = acc.astype(o_ref.dtype)
        sum_ref[...] += jnp.sum(acc, axis=0, keepdims=True)
        sq_ref[...] += jnp.sum(acc * acc, axis=0, keepdims=True)


def _conv_gemm(patches, wmat, *, tm, tk):
    g_n, m_pad, k_pad = patches.shape
    n_pad = wmat.shape[-1]
    grid = (g_n, m_pad // tm, k_pad // tk)
    return pl.pallas_call(
        _conv_stats_kernel,
        out_shape=(
            jax.ShapeDtypeStruct((g_n, m_pad, n_pad), jnp.bfloat16),
            jax.ShapeDtypeStruct((1, n_pad), jnp.float32),
            jax.ShapeDtypeStruct((1, n_pad), jnp.float32),
        ),
        grid=grid,
        in_specs=[
            pl.BlockSpec((None, tm, tk), lambda g, i, k: (g, i, k)),
            pl.BlockSpec((None, tk, n_pad), lambda g, i, k: (g, k, 0)),
        ],
        out_specs=(
            pl.BlockSpec((None, tm, n_pad), lambda g, i, k: (g, i, 0)),
            pl.BlockSpec((1, n_pad), lambda g, i, k: (0, 0)),
            pl.BlockSpec((1, n_pad), lambda g, i, k: (0, 0)),
        ),
        scratch_shapes=[pltpu.VMEM((tm, n_pad), jnp.float32)],
        # Stats are accumulated across the whole grid (resident (1,N) blocks), so the
        # grid stays "arbitrary" here; the BN/act pass below runs "parallel".
        compiler_params=pltpu.CompilerParams(
            dimension_semantics=("arbitrary", "arbitrary", "arbitrary")),
    )(patches, wmat)


# ----------------------------------------------------------------------------
# Kernel 2: precomputed-scale BatchNorm (FMA) + ReLU / LeakyReLU(0.2)
# + optional dropout mask multiply.  Pure streaming pass, 512-row tiles.
# ----------------------------------------------------------------------------
def _bn_act_math(x, scale, shift, relu):
    y = x.astype(jnp.float32) * scale + shift
    if relu:
        return jnp.maximum(y, 0.0)
    return jnp.where(y > 0.0, y, 0.2 * y)


def _bn_act_kernel(x_ref, scale_ref, shift_ref, o_ref, *, relu):
    o_ref[...] = _bn_act_math(x_ref[...], scale_ref[...], shift_ref[...], relu)


def _bn_act_dropout_kernel(x_ref, scale_ref, shift_ref, mask_ref, o_ref, *, relu):
    y = _bn_act_math(x_ref[...], scale_ref[...], shift_ref[...], relu)
    o_ref[...] = y * mask_ref[...].astype(jnp.float32)


def _bn_act(conv2d, scale, shift, mask, *, relu):
    m_tot, n_pad = conv2d.shape
    row_spec = pl.BlockSpec((TM_BN, n_pad), lambda i: (i, 0))
    vec_spec = pl.BlockSpec((1, n_pad), lambda i: (0, 0))
    if mask is None:
        kernel = functools.partial(_bn_act_kernel, relu=relu)
        in_specs = [row_spec, vec_spec, vec_spec]
        args = (conv2d, scale, shift)
    else:
        kernel = functools.partial(_bn_act_dropout_kernel, relu=relu)
        in_specs = [row_spec, vec_spec, vec_spec, row_spec]
        args = (conv2d, scale, shift, mask)
    return pl.pallas_call(
        kernel,
        out_shape=jax.ShapeDtypeStruct((m_tot, n_pad), jnp.float32),
        grid=(m_tot // TM_BN,),
        in_specs=in_specs,
        out_specs=row_spec,
        compiler_params=pltpu.CompilerParams(dimension_semantics=("parallel",)),
    )(*args)


# ----------------------------------------------------------------------------
# Wrapper: patch construction (XLA side), padding, stats -> scale/shift, and
# reassembly back to NCHW.
# TODO(synk): im2col / reflect-pad still materializes the patch matrix in HBM via
# XLA; fusing it into the GEMM kernel (in-kernel patch build) is a remaining opt.
# ----------------------------------------------------------------------------
def block_forward(x, weight, gamma, beta, *, down, activation, use_dropout,
                  seed=0):
    x = x.astype(jnp.float32)
    b, cin, h, w = x.shape
    x_nhwc = jnp.transpose(x, (0, 2, 3, 1))                    # (B, H, W, Cin)

    if down:
        # Conv2d(k=4, s=2, p=1, reflect): reflect-pad then VALID stride-2 conv.
        cout = weight.shape[0]
        ho, wo = h // 2, w // 2
        xp = jnp.pad(x_nhwc, ((0, 0), (1, 1), (1, 1), (0, 0)), mode="reflect")
        taps = []
        for kh in range(4):
            for kw in range(4):
                taps.append(xp[:, kh:kh + 2 * (ho - 1) + 1:2,
                               kw:kw + 2 * (wo - 1) + 1:2, :])   # (B,Ho,Wo,Cin)
        m_sub = b * ho * wo
        patches = jnp.stack(taps, axis=3).reshape(1, m_sub, 16 * cin)
        wmat = jnp.transpose(weight, (2, 3, 1, 0)).reshape(1, 16 * cin, cout)
        groups = 1
    else:
        # ConvTranspose2d(k=4, s=2, p=1) decomposed into 4 parity sub-convs
        # (one per (oh%2, ow%2)); each is a 2x2 stride-1 conv over the un-dilated
        # input -> K = 4*Cin, no multiply-by-zero work.
        cout = weight.shape[1]
        ho, wo = 2 * h, 2 * w
        xp = jnp.pad(x_nhwc, ((0, 0), (1, 1), (1, 1), (0, 0)))
        pg_list, wg_list = [], []
        for poh in range(2):
            for pow_ in range(2):
                taps, wtaps = [], []
                for a in range(2):
                    rh = a + poh
                    kh = (3 - 2 * a) if poh == 0 else (2 - 2 * a)
                    for c in range(2):
                        rw = c + pow_
                        kw = (3 - 2 * c) if pow_ == 0 else (2 - 2 * c)
                        taps.append(xp[:, rh:rh + h, rw:rw + w, :])  # (B,H,W,Cin)
                        wtaps.append(weight[:, :, kh, kw])           # (Cin,Cout)
                pg_list.append(jnp.stack(taps, axis=3).reshape(b * h * w, 4 * cin))
                wg_list.append(jnp.stack(wtaps, axis=0).reshape(4 * cin, cout))
        m_sub = b * h * w
        patches = jnp.stack(pg_list, axis=0)                    # (4, M_sub, 4*Cin)
        wmat = jnp.stack(wg_list, axis=0)                       # (4, 4*Cin, Cout)
        groups = 4

    # --- pad M / K / N so every tile is full and the output is lane-dense ---
    k_dim = patches.shape[-1]
    m_pad = _round_up(m_sub, TM)
    k_pad = _round_up(k_dim, 128)
    if k_pad > MAX_TK:
        k_pad = _round_up(k_pad, MAX_TK)
        tk = MAX_TK
    else:
        tk = k_pad
    n_pad = _round_up(cout, 128)

    patches = jnp.pad(patches, ((0, 0), (0, m_pad - m_sub), (0, k_pad - k_dim)))
    wmat = jnp.pad(wmat, ((0, 0), (0, k_pad - k_dim), (0, n_pad - cout)))

    conv_out, sums, sq = _conv_gemm(patches.astype(jnp.bfloat16),
                                    wmat.astype(jnp.bfloat16), tm=TM, tk=tk)

    # --- BatchNorm scale/shift from the fused stats (zero-padded rows contribute
    #     nothing; divide by the true element count) ---
    m_real = float(groups * m_sub)
    mean = sums / m_real
    var = jnp.maximum(sq / m_real - mean * mean, 0.0)   # clamp: E[x^2]-mean^2 >= 0
    gamma_p = jnp.pad(gamma.astype(jnp.float32), (0, n_pad - cout),
                      constant_values=1.0).reshape(1, n_pad)
    beta_p = jnp.pad(beta.astype(jnp.float32),
                     (0, n_pad - cout)).reshape(1, n_pad)
    scale = gamma_p * jax.lax.rsqrt(var + EPS)
    shift = beta_p - mean * scale

    m_tot = groups * m_pad
    conv2d = conv_out.reshape(m_tot, n_pad)

    if use_dropout:
        # TODO(synk): RNG stream differs from torch.nn.Dropout; the semantics
        # (training-mode p=0.5 zeroing, kept elements scaled by 2) are preserved.
        keep = jax.random.bernoulli(jax.random.PRNGKey(seed), 0.5, (m_tot, n_pad))
        mask = jnp.where(keep, 2.0, 0.0).astype(jnp.bfloat16)
    else:
        mask = None

    y = _bn_act(conv2d, scale, shift, mask, relu=(activation == "relu"))

    # --- strip padding and reassemble NCHW ---
    y = y.reshape(groups, m_pad, n_pad)[:, :m_sub, :cout]
    if down:
        out = y.reshape(b, ho, wo, cout)
    else:
        out = y.reshape(2, 2, b, h, w, cout).transpose(2, 3, 0, 4, 1, 5)
        out = out.reshape(b, ho, wo, cout)
    return out.transpose(0, 3, 1, 2)


# ----------------------------------------------------------------------------
# Pure-JAX reference (no Pallas) for correctness checks.
# ----------------------------------------------------------------------------
def _reference(x, weight, gamma, beta, *, down, activation):
    if down:
        xp = jnp.pad(x, ((0, 0), (0, 0), (1, 1), (1, 1)), mode="reflect")
        conv = jax.lax.conv_general_dilated(
            xp, weight, (2, 2), "VALID",
            dimension_numbers=("NCHW", "OIHW", "NCHW"))
    else:
        w_conv = jnp.transpose(weight, (1, 0, 2, 3))[:, :, ::-1, ::-1]
        conv = jax.lax.conv_general_dilated(
            x, w_conv, (1, 1), [(2, 2), (2, 2)], lhs_dilation=(2, 2),
            dimension_numbers=("NCHW", "OIHW", "NCHW"))
    mean = conv.mean(axis=(0, 2, 3), keepdims=True)
    var = conv.var(axis=(0, 2, 3), keepdims=True)
    y = (conv - mean) * jax.lax.rsqrt(var + EPS) * gamma.reshape(1, -1, 1, 1) \
        + beta.reshape(1, -1, 1, 1)
    return jnp.maximum(y, 0.0) if activation == "relu" else jnp.where(y > 0, y, 0.2 * y)


if __name__ == "__main__":
    key = jax.random.PRNGKey(0)
    k1, k2, k3, k4, k5 = jax.random.split(key, 5)
    B, Cin, Cout, H, W = 2, 4, 8, 16, 16

    x = jax.random.normal(k1, (B, Cin, H, W), jnp.float32)
    w_down = 0.1 * jax.random.normal(k2, (Cout, Cin, 4, 4), jnp.float32)   # Conv2d weight
    w_up = 0.1 * jax.random.normal(k3, (Cin, Cout, 4, 4), jnp.float32)     # ConvTranspose2d weight
    gamma = 1.0 + 0.1 * jax.random.normal(k4, (Cout,), jnp.float32)        # BN weight
    beta = 0.1 * jax.random.normal(k5, (Cout,), jnp.float32)               # BN bias

    # Down block: Conv2d(reflect) -> BatchNorm -> LeakyReLU(0.2), no dropout.
    y_down = block_forward(x, w_down, gamma, beta, down=True,
                           activation="leaky", use_dropout=False)
    jax.block_until_ready(y_down)
    ref_down = _reference(x, w_down, gamma, beta, down=True, activation="leaky")
    assert y_down.shape == (B, Cout, H // 2, W // 2)
    err = jnp.abs(y_down - ref_down)
    assert float(jnp.max(err)) < 1e-1 and float(jnp.mean(err)) < 1e-2  # bf16 operands

    # Up block: ConvTranspose2d -> BatchNorm -> ReLU, no dropout.
    y_up = block_forward(x, w_up, gamma, beta, down=False,
                         activation="relu", use_dropout=False)
    jax.block_until_ready(y_up)
    ref_up = _reference(x, w_up, gamma, beta, down=False, activation="relu")
    assert y_up.shape == (B, Cout, 2 * H, 2 * W)
    err = jnp.abs(y_up - ref_up)
    assert float(jnp.max(err)) < 1e-1 and float(jnp.mean(err)) < 1e-2

    # Up block with training-mode Dropout(0.5) (mask generated with jax.random).
    y_drop = block_forward(x, w_up, gamma, beta, down=False,
                           activation="relu", use_dropout=True, seed=1234)
    jax.block_until_ready(y_drop)
    assert y_drop.shape == (B, Cout, 2 * H, 2 * W)
    assert bool(jnp.all(jnp.isfinite(y_drop)))

    print("KERNEL_OK")
</pallas_src>

<mosaic_0001>
module attributes {stable_mosaic.version = 11 : i64} {
  func.func @_conv_stats_kernel(%arg0: i32, %arg1: i32, %arg2: i32, %arg3: memref<1x512x128xbf16, #tpu.memory_space<vmem>>, %arg4: memref<1x128x128xbf16, #tpu.memory_space<vmem>>, %arg5: memref<1x512x128xbf16, #tpu.memory_space<vmem>>, %arg6: memref<1x128xf32, #tpu.memory_space<vmem>>, %arg7: memref<1x128xf32, #tpu.memory_space<vmem>>, %arg8: memref<512x128xf32, #tpu.memory_space<vmem>>) attributes {dimension_semantics = [#tpu.dimension_semantics<arbitrary>, #tpu.dimension_semantics<arbitrary>, #tpu.dimension_semantics<arbitrary>], iteration_bounds = array<i64: 1, 1, 1>, scalar_prefetch = 0 : i64, scratch_operands = 1 : i64, tpu.core_type = #tpu.core_type<tc>, window_params = [{transform_indices = @transform_0, window_bounds = array<i64: 1, 512, 128>}, {transform_indices = @transform_1, window_bounds = array<i64: 1, 128, 128>}, {transform_indices = @transform_2, window_bounds = array<i64: 1, 512, 128>}, {pipeline_mode = #tpu.pipeline_mode<synchronous>, transform_indices = @transform_3, window_bounds = array<i64: 1, 128>}, {pipeline_mode = #tpu.pipeline_mode<synchronous>, transform_indices = @transform_4, window_bounds = array<i64: 1, 128>}]} {
    %c0_i32 = arith.constant 0 : i32
    %0 = arith.cmpi eq, %arg2, %c0_i32 : i32
    %1 = arith.extui %0 : i1 to i32
    %c0_i32_0 = arith.constant 0 : i32
    %2 = arith.cmpi ne, %1, %c0_i32_0 : i32
    scf.if %2 {
      %cst_16 = arith.constant 0.000000e+00 : f32
      %21 = vector.broadcast %cst_16 : f32 to vector<512x128xf32>
      %c0_17 = arith.constant 0 : index
      %c0_18 = arith.constant 0 : index
      %22 = vector.load %arg8[%c0_17, %c0_18] : memref<512x128xf32, #tpu.memory_space<vmem>>, vector<512x128xf32>
      tpu.vector_store %arg8[%c0_17, %c0_18], %21 {strides = array<i32>} : memref<512x128xf32, #tpu.memory_space<vmem>>, vector<512x128xf32>,
    } else {
    }
    %c0 = arith.constant 0 : index
    %c0_1 = arith.constant 0 : index
    %3 = vector.load %arg8[%c0, %c0_1] : memref<512x128xf32, #tpu.memory_space<vmem>>, vector<512x128xf32>
    %c0_2 = arith.constant 0 : index
    %c0_3 = arith.constant 0 : index
    %c0_4 = arith.constant 0 : index
    %4 = vector.load %arg3[%c0_2, %c0_3, %c0_4] : memref<1x512x128xbf16, #tpu.memory_space<vmem>>, vector<1x512x128xbf16>
    %5 = vector.shape_cast %4 : vector<1x512x128xbf16> to vector<512x128xbf16>
    %c0_5 = arith.constant 0 : index
    %c0_6 = arith.constant 0 : index
    %c0_7 = arith.constant 0 : index
    %6 = vector.load %arg4[%c0_5, %c0_6, %c0_7] : memref<1x128x128xbf16, #tpu.memory_space<vmem>>, vector<1x128x128xbf16>
    %7 = vector.shape_cast %6 : vector<1x128x128xbf16> to vector<128x128xbf16>
    %cst = arith.constant dense<0.000000e+00> : vector<512x128xf32>
    %8 = tpu.matmul %5, %7, %cst {dimension_numbers = #tpu.dot_dimension_numbers<[1], [0], [0], [1], [0, 0, 1, 1], [], []>} : vector<512x128xbf16>, vector<128x128xbf16>, vector<512x128xf32> -> vector<512x128xf32>
    %9 = arith.addf %3, %8 : vector<512x128xf32>
    %c0_8 = arith.constant 0 : index
    %c0_9 = arith.constant 0 : index
    %10 = vector.load %arg8[%c0_8, %c0_9] : memref<512x128xf32, #tpu.memory_space<vmem>>, vector<512x128xf32>
    tpu.vector_store %arg8[%c0_8, %c0_9], %9 {strides = array<i32>} : memref<512x128xf32, #tpu.memory_space<vmem>>, vector<512x128xf32>,
    %c0_i32_10 = arith.constant 0 : i32
    %11 = arith.cmpi eq, %arg0, %c0_i32_10 : i32
    %c0_i32_11 = arith.constant 0 : i32
    %12 = arith.cmpi eq, %arg1, %c0_i32_11 : i32
    %13 = arith.andi %11, %12 : i1
    %c0_i32_12 = arith.constant 0 : i32
    %14 = arith.cmpi eq, %arg2, %c0_i32_12 : i32
    %15 = arith.andi %13, %14 : i1
    %16 = arith.extui %15 : i1 to i32
    %c0_i32_13 = arith.constant 0 : i32
    %17 = arith.cmpi ne, %16, %c0_i32_13 : i32
    scf.if %17 {
      %cst_16 = arith.constant 0.000000e+00 : f32
      %21 = vector.broadcast %cst_16 : f32 to vector<1x128xf32>
      %c0_17 = arith.constant 0 : index
      %c0_18 = arith.constant 0 : index
      %22 = vector.load %arg6[%c0_17, %c0_18] : memref<1x128xf32, #tpu.memory_space<vmem>>, vector<1x128xf32>
      tpu.vector_store %arg6[%c0_17, %c0_18], %21 {strides = array<i32>} : memref<1x128xf32, #tpu.memory_space<vmem>>, vector<1x128xf32>,
      %cst_19 = arith.constant 0.000000e+00 : f32
      %23 = vector.broadcast %cst_19 : f32 to vector<1x128xf32>
      %c0_20 = arith.constant 0 : index
      %c0_21 = arith.constant 0 : index
      %24 = vector.load %arg7[%c0_20, %c0_21] : memref<1x128xf32, #tpu.memory_space<vmem>>, vector<1x128xf32>
      tpu.vector_store %arg7[%c0_20, %c0_21], %23 {strides = array<i32>} : memref<1x128xf32, #tpu.memory_space<vmem>>, vector<1x128xf32>,
    } else {
    }
    %c0_i32_14 = arith.constant 0 : i32
    %18 = arith.cmpi eq, %arg2, %c0_i32_14 : i32
    %19 = arith.extui %18 : i1 to i32
    %c0_i32_15 = arith.constant 0 : i32
    %20 = arith.cmpi ne, %19, %c0_i32_15 : i32
    scf.if %20 {
      %c0_16 = arith.constant 0 : index
      %c0_17 = arith.constant 0 : index
      %21 = vector.load %arg8[%c0_16, %c0_17] : memref<512x128xf32, #tpu.memory_space<vmem>>, vector<512x128xf32>
      %22 = arith.truncf %21 : vector<512x128xf32> to vector<512x128xbf16>
      %c0_18 = arith.constant 0 : index
      %c0_19 = arith.constant 0 : index
      %c0_20 = arith.constant 0 : index
      %23 = vector.load %arg5[%c0_18, %c0_19, %c0_20] : memref<1x512x128xbf16, #tpu.memory_space<vmem>>, vector<1x512x128xbf16>
      %24 = vector.shape_cast %23 : vector<1x512x128xbf16> to vector<512x128xbf16>
      %25 = vector.shape_cast %22 : vector<512x128xbf16> to vector<1x512x128xbf16>
      tpu.vector_store %arg5[%c0_18, %c0_19, %c0_20], %25 {strides = array<i32>} : memref<1x512x128xbf16, #tpu.memory_space<vmem>>, vector<1x512x128xbf16>,
      %c0_21 = arith.constant 0 : index
      %c0_22 = arith.constant 0 : index
      %26 = vector.load %arg6[%c0_21, %c0_22] : memref<1x128xf32, #tpu.memory_space<vmem>>, vector<1x128xf32>
      %cst_23 = arith.constant dense<0.000000e+00> : vector<128xf32>
      %27 = vector.multi_reduction <add>, %21, %cst_23 [0] : vector<512x128xf32> to vector<128xf32>
      %28 = vector.shape_cast %27 : vector<128xf32> to vector<1x128xf32>
      %29 = arith.addf %26, %28 : vector<1x128xf32>
      %c0_24 = arith.constant 0 : index
      %c0_25 = arith.constant 0 : index
      %30 = vector.load %arg6[%c0_24, %c0_25] : memref<1x128xf32, #tpu.memory_space<vmem>>, vector<1x128xf32>
      tpu.vector_store %arg6[%c0_24, %c0_25], %29 {strides = array<i32>} : memref<1x128xf32, #tpu.memory_space<vmem>>, vector<1x128xf32>,
      %c0_26 = arith.constant 0 : index
      %c0_27 = arith.constant 0 : index
      %31 = vector.load %arg7[%c0_26, %c0_27] : memref<1x128xf32, #tpu.memory_space<vmem>>, vector<1x128xf32>
      %32 = arith.mulf %21, %21 : vector<512x128xf32>
      %cst_28 = arith.constant dense<0.000000e+00> : vector<128xf32>
      %33 = vector.multi_reduction <add>, %32, %cst_28 [0] : vector<512x128xf32> to vector<128xf32>
      %34 = vector.shape_cast %33 : vector<128xf32> to vector<1x128xf32>
      %35 = arith.addf %31, %34 : vector<1x128xf32>
      %c0_29 = arith.constant 0 : index
      %c0_30 = arith.constant 0 : index
      %36 = vector.load %arg7[%c0_29, %c0_30] : memref<1x128xf32, #tpu.memory_space<vmem>>, vector<1x128xf32>
      tpu.vector_store %arg7[%c0_29, %c0_30], %35 {strides = array<i32>} : memref<1x128xf32, #tpu.memory_space<vmem>>, vector<1x128xf32>,
    } else {
    }
    return
  }
  func.func @transform_0(%arg0: i32, %arg1: i32, %arg2: i32) -> (i32, i32, i32) {
    %c0_i32 = arith.constant 0 : i32
    return %arg0, %arg1, %arg2 : i32, i32, i32
  }
  func.func @transform_1(%arg0: i32, %arg1: i32, %arg2: i32) -> (i32, i32, i32) {
    %c0_i32 = arith.constant 0 : i32
    %c0_i32_0 = arith.constant 0 : i32
    return %arg0, %arg2, %c0_i32 : i32, i32, i32
  }
  func.func @transform_2(%arg0: i32, %arg1: i32, %arg2: i32) -> (i32, i32, i32) {
    %c0_i32 = arith.constant 0 : i32
    %c0_i32_0 = arith.constant 0 : i32
    return %arg0, %arg1, %c0_i32 : i32, i32, i32
  }
  func.func @transform_3(%arg0: i32, %arg1: i32, %arg2: i32) -> (i32, i32) {
    %c0_i32 = arith.constant 0 : i32
    %c0_i32_0 = arith.constant 0 : i32
    %c0_i32_1 = arith.constant 0 : i32
    return %c0_i32, %c0_i32_0 : i32, i32
  }
  func.func @transform_4(%arg0: i32, %arg1: i32, %arg2: i32) -> (i32, i32) {
    %c0_i32 = arith.constant 0 : i32
    %c0_i32_0 = arith.constant 0 : i32
    %c0_i32_1 = arith.constant 0 : i32
    return %c0_i32, %c0_i32_0 : i32, i32
  }
}

</mosaic_0001>

<bundles_post_ra>
// kernel: tpu_custom_call.1
= control target key start
LH: loop header
LB: loop body
LE: loop exit
PB: predicated region body
PF: predicated region fallthrough
CT: control target
= control target key end

     0   :  { %10 = vsyncpa [#allocation4], 0  ;;  %s2527_s0 = inlined_call_operand.hbm [shape: bf16[1,512,128], index: 0, kind: input, shape index: {}]   ;;  %s2528_s1 = inlined_call_operand.hbm [shape: bf16[1,128,128], index: 1, kind: input, shape index: {}]   ;;  %s2529_s2 = inlined_call_operand.hbm [shape: bf16[1,512,128], index: 2, kind: output, shape index: {0}]   ;;  %s2530_s3 = inlined_call_operand.hbm [shape: f32[1,128], index: 3, kind: output, shape index: {1}]   ;;  %s2531_s4 = inlined_call_operand.hbm [shape: f32[1,128], index: 4, kind: output, shape index: {2}]  }
   0x1   :  { %11 = vsyncpa [#allocation7], 0 }
   0x2   :  { %12 = vsyncpa [#allocation5], 0 }
   0x3   :  { %13 = vsyncpa [#allocation10], 0  ;;  %s2225_s15 = smov [#allocation3]   ;;  %s2107_s19 = scalar_lea.hbm %s2527_s0, 4096 }
   0x4   :  { %s19_s16 = sshll.u32 %s2225_s15, 4  ;;  %p2108_p0 = scmp.ne.s32.totalorder %s2527_s0, %s2107_s19  ;;  %s20_s16 = int_to_ptr.vmem [resolvable:$true] %s19_s16 }
   0x5   :  { %p2111_p1 = scmp.lt.u32.totalorder %s2107_s19, %s2527_s0 }
   0x7   :  { %p2113_p2 = pnand %p2111_p1, %p2108_p0 }
   0x9   :  { %2116 = shalt.err (!%p2113_p2)
}
   0xa   :  { %s2117_s24 = scalar_lea.vmem %s20_s16, 4096  ;;  %p2122_p4 = scmp.lt.s32.totalorder %s20_s16, %s20_s16 }
   0xb   :  { %p2118_p3 = scmp.ne.s32.totalorder %s20_s16, %s2117_s24  ;;  %p2123_p5 = scmp.lt.s32.totalorder %s2117_s24, %s2117_s24 }
   0xd   :  { %p2124_p6 = por %p2123_p5, %p2122_p4 }
   0xf   :  { %p2125_p7 = pnand %p2124_p6, %p2118_p3 }
  0x11   :  { %2128 = shalt.err (!%p2125_p7)
}
  0x12   :  { %s2226_s25 = smov 64   ;;  %s2227_s26 = smov 4  }
  0x13   :  { %25 = dma.hbm_to_vmem [thread:$0]  %s2527_s0, 4096, %s20_s16, [#allocation4], %s2226_s25, %s2226_s25, %s2227_s26  }
  0x14   :  { %s2228_s29 = smov [#allocation6]   ;;  %s2129_s7 = scalar_lea.hbm %s2528_s1, 1024 }
  0x15   :  { %s31_s30 = sshll.u32 %s2228_s29, 4  ;;  %p2130_p8 = scmp.ne.s32.totalorder %s2528_s1, %s2129_s7  ;;  %s32_s30 = int_to_ptr.vmem [resolvable:$true] %s31_s30 }
  0x16   :  { %p2133_p9 = scmp.lt.u32.totalorder %s2129_s7, %s2528_s1 }
  0x18   :  { %p2135_p10 = pnand %p2133_p9, %p2130_p8 }
  0x1a   :  { %2138 = shalt.err (!%p2135_p10)
}
  0x1b   :  { %s2139_s12 = scalar_lea.vmem %s32_s30, 1024  ;;  %p2144_p12 = scmp.lt.s32.totalorder %s32_s30, %s32_s30 }
  0x1c   :  { %p2140_p11 = scmp.ne.s32.totalorder %s32_s30, %s2139_s12  ;;  %p2145_p13 = scmp.lt.s32.totalorder %s2139_s12, %s2139_s12 }
  0x1e   :  { %p2146_p0 = por %p2145_p13, %p2144_p12 }
  0x20   :  { %p2147_p1 = pnand %p2146_p0, %p2140_p11 }
  0x22   :  { %2150 = shalt.err (!%p2147_p1)
}
  0x23   :  { %37 = dma.hbm_to_vmem [thread:$0]  %s2528_s1, 1024, %s32_s30, [#allocation7], %s2226_s25, %s2226_s25, %s2227_s26  }
  0x24   :  { %2217 = dma.done.wait [#allocation4], 4096  }
  0x25   :  { %2218 = vsyncadd [#allocation4], 4294963200 }
  0x26   :  { %2219 = dma.done.wait [#allocation7], 1024  }
  0x27   :  { %2220 = vsyncadd [#allocation7], 4294966272  ;;  %v2067_v0 = vld [vmem:[#allocation6] sm:$0xff]   ;;  %v2068_v1 = vld [vmem:[#allocation6 + $0x8] sm:$0xff]   ;;  %v2229_v58 = vmov 0.0   ;;  %s2230_s1 = smov [#allocation8]  }
  0x28   :  { %1963 = vmatprep.subr.bf16.mxu0 %v2067_v0  ;;  %2043 = vmatprep.subr.bf16.mxu1 %v2067_v0  ;;  %v2069_v2 = vld [vmem:[#allocation6 + $0x10] sm:$0xff]   ;;  %v2070_v3 = vld [vmem:[#allocation6 + $0x18] sm:$0xff]   ;;  %v2075_v4 = vld [vmem:[#allocation3] sm:$0xff]   ;;  %922 = vst [vmem:[#allocation9] sm:$0x1] %v2229_v58  ;;  %s1524_s14 = sshll.u32 %s2230_s1, 4  ;;  %s1525_s14 = int_to_ptr.vmem [resolvable:$true] %s1524_s14 }
  0x29   :  { %1964 = vmatpush3.bf16.msra.mxu0 %v2067_v0  ;;  %2051 = vmatpush3.bf16.msra.mxu1 %v2067_v0  ;;  %v2071_v5 = vld [vmem:[#allocation6 + $0x20] sm:$0xff]   ;;  %v2072_v6 = vld [vmem:[#allocation6 + $0x28] sm:$0xff]   ;;  %v2073_v7 = vld [vmem:[#allocation6 + $0x30] sm:$0xff]   ;;  %923 = vst [vmem:[#allocation11] sm:$0x1] %v2229_v58  ;;  %s2151_s15 = scalar_lea.vmem %s1525_s14, 4096  ;;  %p2156_p3 = scmp.lt.s32.totalorder %s1525_s14, %s1525_s14 }
  0x2a   :  { %1965 = vmatprep.subr.bf16.mxu0 %v2068_v1  ;;  %2044 = vmatprep.subr.bf16.mxu1 %v2068_v1  ;;  %v2074_v8 = vld [vmem:[#allocation6 + $0x38] sm:$0xff]   ;;  %v2091_v9 = vld [vmem:[#allocation3 + $0x80] sm:$0xff]   ;;  %v2076_v10 = vld [vmem:[#allocation3 + $0x8] sm:$0xff]   ;;  %p2152_p2 = scmp.ne.s32.totalorder %s1525_s14, %s2151_s15  ;;  %p2157_p4 = scmp.lt.s32.totalorder %s2151_s15, %s2151_s15 }
  0x2b   :  { %1979 = vmatprep.mubr.bf16.mxu0 %v2075_v4  ;;  %2011 = vmatprep.mubr.bf16.mxu1 %v2091_v9  ;;  %v2077_v11 = vld [vmem:[#allocation3 + $0x10] sm:$0xff]   ;;  %v2092_v12 = vld [vmem:[#allocation3 + $0x88] sm:$0xff]   ;;  %v2078_v14 = vld [vmem:[#allocation3 + $0x18] sm:$0xff]  }
  0x2c   :  { %v2093_v13 = vld [vmem:[#allocation3 + $0x90] sm:$0xff]   ;;  %v2079_v15 = vld [vmem:[#allocation3 + $0x20] sm:$0xff]   ;;  %v2094_v16 = vld [vmem:[#allocation3 + $0x98] sm:$0xff]   ;;  %p2158_p5 = por %p2157_p4, %p2156_p3 }
  0x2d   :  { %1966 = vmatpush3.bf16.msra.mxu0 %v2068_v1  ;;  %2052 = vmatpush3.bf16.msra.mxu1 %v2068_v1  ;;  %v2095_v17 = vld [vmem:[#allocation3 + $0xa0] sm:$0xff]   ;;  %v2080_v18 = vld [vmem:[#allocation3 + $0x28] sm:$0xff]   ;;  %v2081_v20 = vld [vmem:[#allocation3 + $0x30] sm:$0xff]  }
  0x2e   :  { %1967 = vmatprep.subr.bf16.mxu0 %v2069_v2  ;;  %2045 = vmatprep.subr.bf16.mxu1 %v2069_v2  ;;  %v2096_v19 = vld [vmem:[#allocation3 + $0xa8] sm:$0xff]   ;;  %v2097_v21 = vld [vmem:[#allocation3 + $0xb0] sm:$0xff]   ;;  %v2082_v22 = vld [vmem:[#allocation3 + $0x38] sm:$0xff]   ;;  %p2159_p6 = pnand %p2158_p5, %p2152_p2 }
  0x2f   :  { %v2098_v23 = vld [vmem:[#allocation3 + $0xb8] sm:$0xff]   ;;  %v2083_v24 = vld [vmem:[#allocation3 + $0x40] sm:$0xff]   ;;  %v2084_v26 = vld [vmem:[#allocation3 + $0x48] sm:$0xff]  }
  0x30   :  { %v2099_v25 = vld [vmem:[#allocation3 + $0xc0] sm:$0xff]   ;;  %v2100_v27 = vld [vmem:[#allocation3 + $0xc8] sm:$0xff]   ;;  %v2085_v28 = vld [vmem:[#allocation3 + $0x50] sm:$0xff]  }
  0x31   :  { %1968 = vmatpush3.bf16.msra.mxu0 %v2069_v2  ;;  %2053 = vmatpush3.bf16.msra.mxu1 %v2069_v2  ;;  %v2101_v29 = vld [vmem:[#allocation3 + $0xd0] sm:$0xff]   ;;  %v2086_v30 = vld [vmem:[#allocation3 + $0x58] sm:$0xff]   ;;  %v2087_v32 = vld [vmem:[#allocation3 + $0x60] sm:$0xff]  }
  0x32   :  { %1969 = vmatprep.subr.bf16.mxu0 %v2070_v3  ;;  %2046 = vmatprep.subr.bf16.mxu1 %v2070_v3  ;;  %v2102_v31 = vld [vmem:[#allocation3 + $0xd8] sm:$0xff]   ;;  %v2103_v33 = vld [vmem:[#allocation3 + $0xe0] sm:$0xff]   ;;  %v2088_v34 = vld [vmem:[#allocation3 + $0x68] sm:$0xff]  }
  0x33   :  { %v2104_v35 = vld [vmem:[#allocation3 + $0xe8] sm:$0xff]   ;;  %v2089_v36 = vld [vmem:[#allocation3 + $0x70] sm:$0xff]   ;;  %v2090_v38 = vld [vmem:[#allocation3 + $0x78] sm:$0xff]  }
  0x34   :  { %v2105_v37 = vld [vmem:[#allocation3 + $0xf0] sm:$0xff]   ;;  %v2106_v39 = vld [vmem:[#allocation3 + $0xf8] sm:$0xff]  }
  0x35   :  { %1970 = vmatpush3.bf16.msra.mxu0 %v2070_v3  ;;  %2054 = vmatpush3.bf16.msra.mxu1 %v2070_v3 }
  0x36   :  { %1971 = vmatprep.subr.bf16.mxu0 %v2071_v5  ;;  %2047 = vmatprep.subr.bf16.mxu1 %v2071_v5 }
  0x39   :  { %1972 = vmatpush3.bf16.msra.mxu0 %v2071_v5  ;;  %2055 = vmatpush3.bf16.msra.mxu1 %v2071_v5 }
  0x3a   :  { %1973 = vmatprep.subr.bf16.mxu0 %v2072_v6  ;;  %2048 = vmatprep.subr.bf16.mxu1 %v2072_v6 }
  0x3d   :  { %1974 = vmatpush3.bf16.msra.mxu0 %v2072_v6  ;;  %2056 = vmatpush3.bf16.msra.mxu1 %v2072_v6 }
  0x3e   :  { %1975 = vmatprep.subr.bf16.mxu0 %v2073_v7  ;;  %2049 = vmatprep.subr.bf16.mxu1 %v2073_v7 }
  0x41   :  { %1976 = vmatpush3.bf16.msra.mxu0 %v2073_v7  ;;  %2057 = vmatpush3.bf16.msra.mxu1 %v2073_v7 }
  0x42   :  { %1977 = vmatprep.subr.bf16.mxu0 %v2074_v8  ;;  %2050 = vmatprep.subr.bf16.mxu1 %v2074_v8 }
  0x45   :  { %1978 = vmatpush3.bf16.msra.mxu0 %v2074_v8  ;;  %2058 = vmatpush3.bf16.msra.mxu1 %v2074_v8 }
  0x48   :  { %1980 = vmatmul.mubr.bf16.vlgmr.msra.gmra.mrb[0].mxu0 %v2076_v10  ;;  %2012 = vmatmul.mubr.bf16.vlgmr.msra.gmra.mrb[0].mxu1 %v2092_v12 }
  0x49   :  { %1983 = vmatprep.mubr.bf16.mxu0 %v2077_v11  ;;  %2015 = vmatprep.mubr.bf16.mxu1 %v2093_v13 }
  0x50   :  { %1984 = vmatmul.mubr.bf16.gmra.mrb[4].mxu0 %v2078_v14  ;;  %2016 = vmatmul.mubr.bf16.gmra.mrb[4].mxu1 %v2094_v16 }
  0x51   :  { %1987 = vmatprep.mubr.bf16.mxu0 %v2079_v15  ;;  %2019 = vmatprep.mubr.bf16.mxu1 %v2095_v17 }
  0x58   :  { %1988 = vmatmul.mubr.bf16.gmra.mrb[8].mxu0 %v2080_v18  ;;  %2020 = vmatmul.mubr.bf16.gmra.mrb[8].mxu1 %v2096_v19 }
  0x59   :  { %1991 = vmatprep.mubr.bf16.mxu0 %v2081_v20  ;;  %2023 = vmatprep.mubr.bf16.mxu1 %v2097_v21 }
  0x60   :  { %1992 = vmatmul.mubr.bf16.gmra.mrb[12].mxu0 %v2082_v22  ;;  %2024 = vmatmul.mubr.bf16.gmra.mrb[12].mxu1 %v2098_v23 }
  0x61   :  { %1995 = vmatprep.mubr.bf16.mxu0 %v2083_v24  ;;  %2027 = vmatprep.mubr.bf16.mxu1 %v2099_v25 }
  0x68   :  { %1996 = vmatmul.mubr.bf16.gmra.mrb[16].mxu0 %v2084_v26  ;;  %2028 = vmatmul.mubr.bf16.gmra.mrb[16].mxu1 %v2100_v27 }
  0x69   :  { %1999 = vmatprep.mubr.bf16.mxu0 %v2085_v28  ;;  %2031 = vmatprep.mubr.bf16.mxu1 %v2101_v29 }
  0x70   :  { %2000 = vmatmul.mubr.bf16.gmra.mrb[20].mxu0 %v2086_v30  ;;  %2032 = vmatmul.mubr.bf16.gmra.mrb[20].mxu1 %v2102_v31 }
  0x71   :  { %2003 = vmatprep.mubr.bf16.mxu0 %v2087_v32  ;;  %2035 = vmatprep.mubr.bf16.mxu1 %v2103_v33 }
  0x78   :  { %2004 = vmatmul.mubr.bf16.gmra.mrb[24].mxu0 %v2088_v34  ;;  %2036 = vmatmul.mubr.bf16.gmra.mrb[24].mxu1 %v2104_v35 }
  0x79   :  { %2007 = vmatprep.mubr.bf16.mxu0 %v2089_v36  ;;  %2039 = vmatprep.mubr.bf16.mxu1 %v2105_v37 }
  0x80   :  { %2008 = vmatmul.mubr.bf16.gmra.mrb[28].mxu0 %v2090_v38  ;;  %2040 = vmatmul.mubr.bf16.gmra.mrb[28].mxu1 %v2106_v39 }
 0x11b   :  { %v1981_v40 = vpop.f32.mrb[0].mxu0  ;;  %v2288_v41 = vpop.f32.mrb[0].mxu1 }
 0x11c   :  { %v531_v42 = vpop.f32.mrb[1].mxu0  ;;  %v2290_v43 = vpop.f32.mrb[1].mxu1  ;;  %v1386_v55 = vmul.f32 %v1981_v40, %v1981_v40 }
 0x11d   :  { %v1982_v44 = vpop.f32.mrb[2].mxu0  ;;  %v2292_v45 = vpop.f32.mrb[2].mxu1  ;;  %v1384_v46 = vmul.f32 %v531_v42, %v531_v42 }
 0x11e   :  { %v1740_v47 = vpack.c.bf16 %v1982_v44, %v1981_v40  ;;  %v534_v48 = vpop.f32.mrb[3].mxu0  ;;  %v1820_v49 = vpack.c.bf16 %v2292_v45, %v2288_v41  ;;  %v2296_v50 = vpop.f32.mrb[3].mxu1  ;;  %v1387_v59 = vmul.f32 %v1982_v44, %v1982_v44 }
 0x11f   :  { %v1735_v51 = vpack.c.bf16 %v534_v48, %v531_v42  ;;  %v1312_v52 = vadd.f32 %v534_v48, %v531_v42  ;;  %v1385_v53 = vmul.f32 %v534_v48, %v534_v48  ;;  %v1815_v54 = vpack.c.bf16 %v2296_v50, %v2290_v43 }
 0x120   :  { %1892 = vst [vmem:[#allocation8 + $0x8] sm:$0xff] %v1740_v47   ;;  %1908 = vst [vmem:[#allocation8 + $0x88] sm:$0xff] %v1820_v49  }
 0x121   :  { %1736 = vst [vmem:[#allocation8] sm:$0xff] %v1735_v51   ;;  %v1313_v56 = vadd.f32 %v1981_v40, %v1312_v52  ;;  %v1448_v57 = vadd.f32 %v1385_v53, %v1384_v46  ;;  %1907 = vst [vmem:[#allocation8 + $0x80] sm:$0xff] %v1815_v54  }
 0x123   :  { %v1449_v60 = vadd.f32 %v1448_v57, %v1386_v55  ;;  %v1985_v61 = vpop.f32.mrb[4].mxu0  ;;  %v1314_v62 = vadd.f32 %v1982_v44, %v1313_v56  ;;  %v2300_v63 = vpop.f32.mrb[4].mxu1 }
 0x124   :  { %v547_v0 = vpop.f32.mrb[5].mxu0  ;;  %v2302_v1 = vpop.f32.mrb[5].mxu1  ;;  %v1390_v16 = vmul.f32 %v1985_v61, %v1985_v61 }
 0x125   :  { %v1315_v2 = vadd.f32 %v1314_v62, %v547_v0  ;;  %v1388_v3 = vmul.f32 %v547_v0, %v547_v0  ;;  %v1450_v4 = vadd.f32 %v1449_v60, %v1387_v59  ;;  %v1986_v5 = vpop.f32.mrb[6].mxu0  ;;  %v2304_v6 = vpop.f32.mrb[6].mxu1 }
 0x126   :  { %v1750_v7 = vpack.c.bf16 %v1986_v5, %v1985_v61  ;;  %v550_v8 = vpop.f32.mrb[7].mxu0  ;;  %v1830_v9 = vpack.c.bf16 %v2304_v6, %v2300_v63  ;;  %v2308_v10 = vpop.f32.mrb[7].mxu1  ;;  %v1391_v19 = vmul.f32 %v1986_v5, %v1986_v5 }
 0x127   :  { %v1451_v11 = vadd.f32 %v1450_v4, %v1388_v3  ;;  %v1745_v12 = vpack.c.bf16 %v550_v8, %v547_v0  ;;  %v1316_v13 = vadd.f32 %v1315_v2, %v550_v8  ;;  %v1389_v14 = vmul.f32 %v550_v8, %v550_v8 }
 0x128   :  { %1894 = vst [vmem:[#allocation8 + $0x18] sm:$0xff] %v1750_v7   ;;  %1910 = vst [vmem:[#allocation8 + $0x98] sm:$0xff] %v1830_v9   ;;  %v1825_v15 = vpack.c.bf16 %v2308_v10, %v2302_v1 }
 0x129   :  { %1893 = vst [vmem:[#allocation8 + $0x10] sm:$0xff] %v1745_v12   ;;  %v1317_v17 = vadd.f32 %v1985_v61, %v1316_v13  ;;  %v1452_v18 = vadd.f32 %v1451_v11, %v1389_v14 }
 0x12a   :  { %1909 = vst [vmem:[#allocation8 + $0x90] sm:$0xff] %v1825_v15  }
 0x12b   :  { %v1453_v20 = vadd.f32 %v1452_v18, %v1390_v16  ;;  %v1989_v21 = vpop.f32.mrb[8].mxu0  ;;  %v1318_v22 = vadd.f32 %v1986_v5, %v1317_v17  ;;  %v2312_v23 = vpop.f32.mrb[8].mxu1 }
 0x12c   :  { %v563_v24 = vpop.f32.mrb[9].mxu0  ;;  %v2314_v25 = vpop.f32.mrb[9].mxu1  ;;  %v1394_v40 = vmul.f32 %v1989_v21, %v1989_v21 }
 0x12d   :  { %v1319_v26 = vadd.f32 %v1318_v22, %v563_v24  ;;  %v1392_v27 = vmul.f32 %v563_v24, %v563_v24  ;;  %v1454_v28 = vadd.f32 %v1453_v20, %v1391_v19  ;;  %v1990_v29 = vpop.f32.mrb[10].mxu0  ;;  %v2316_v30 = vpop.f32.mrb[10].mxu1 }
 0x12e   :  { %v1760_v31 = vpack.c.bf16 %v1990_v29, %v1989_v21  ;;  %v566_v32 = vpop.f32.mrb[11].mxu0  ;;  %v1840_v33 = vpack.c.bf16 %v2316_v30, %v2312_v23  ;;  %v2320_v34 = vpop.f32.mrb[11].mxu1  ;;  %v1395_v46 = vmul.f32 %v1990_v29, %v1990_v29 }
 0x12f   :  { %v1455_v35 = vadd.f32 %v1454_v28, %v1392_v27  ;;  %v1755_v36 = vpack.c.bf16 %v566_v32, %v563_v24  ;;  %v1320_v37 = vadd.f32 %v1319_v26, %v566_v32  ;;  %v1393_v38 = vmul.f32 %v566_v32, %v566_v32 }
 0x130   :  { %1896 = vst [vmem:[#allocation8 + $0x28] sm:$0xff] %v1760_v31   ;;  %1912 = vst [vmem:[#allocation8 + $0xa8] sm:$0xff] %v1840_v33   ;;  %v1835_v39 = vpack.c.bf16 %v2320_v34, %v2314_v25 }
 0x131   :  { %1895 = vst [vmem:[#allocation8 + $0x20] sm:$0xff] %v1755_v36   ;;  %v1321_v42 = vadd.f32 %v1989_v21, %v1320_v37  ;;  %v1456_v44 = vadd.f32 %v1455_v35, %v1393_v38 }
 0x132   :  { %1911 = vst [vmem:[#allocation8 + $0xa0] sm:$0xff] %v1835_v39  }
 0x133   :  { %v1457_v47 = vadd.f32 %v1456_v44, %v1394_v40  ;;  %v1993_v48 = vpop.f32.mrb[12].mxu0  ;;  %v1322_v49 = vadd.f32 %v1990_v29, %v1321_v42  ;;  %v2324_v51 = vpop.f32.mrb[12].mxu1 }
 0x134   :  { %v579_v52 = vpop.f32.mrb[13].mxu0  ;;  %v2326_v53 = vpop.f32.mrb[13].mxu1  ;;  %v1398_v7 = vmul.f32 %v1993_v48, %v1993_v48 }
 0x135   :  { %v1323_v54 = vadd.f32 %v1322_v49, %v579_v52  ;;  %v1396_v55 = vmul.f32 %v579_v52, %v579_v52  ;;  %v1458_v56 = vadd.f32 %v1457_v47, %v1395_v46  ;;  %v1994_v57 = vpop.f32.mrb[14].mxu0  ;;  %v2328_v58 = vpop.f32.mrb[14].mxu1 }
 0x136   :  { %v1770_v59 = vpack.c.bf16 %v1994_v57, %v1993_v48  ;;  %v582_v60 = vpop.f32.mrb[15].mxu0  ;;  %v1850_v61 = vpack.c.bf16 %v2328_v58, %v2324_v51  ;;  %v2332_v62 = vpop.f32.mrb[15].mxu1  ;;  %v1399_v11 = vmul.f32 %v1994_v57, %v1994_v57 }
 0x137   :  { %v1459_v0 = vadd.f32 %v1458_v56, %v1396_v55  ;;  %v1765_v2 = vpack.c.bf16 %v582_v60, %v579_v52  ;;  %v1324_v3 = vadd.f32 %v1323_v54, %v582_v60  ;;  %v1397_v4 = vmul.f32 %v582_v60, %v582_v60 }
 0x138   :  { %1898 = vst [vmem:[#allocation8 + $0x38] sm:$0xff] %v1770_v59   ;;  %1914 = vst [vmem:[#allocation8 + $0xb8] sm:$0xff] %v1850_v61   ;;  %v1845_v5 = vpack.c.bf16 %v2332_v62, %v2326_v53 }
 0x139   :  { %1897 = vst [vmem:[#allocation8 + $0x30] sm:$0xff] %v1765_v2   ;;  %v1325_v8 = vadd.f32 %v1993_v48, %v1324_v3  ;;  %v1460_v9 = vadd.f32 %v1459_v0, %v1397_v4 }
 0x13a   :  { %1913 = vst [vmem:[#allocation8 + $0xb0] sm:$0xff] %v1845_v5  }
 0x13b   :  { %v1461_v12 = vadd.f32 %v1460_v9, %v1398_v7  ;;  %v1997_v13 = vpop.f32.mrb[16].mxu0  ;;  %v1326_v14 = vadd.f32 %v1994_v57, %v1325_v8  ;;  %v2336_v15 = vpop.f32.mrb[16].mxu1 }
 0x13c   :  { %v595_v16 = vpop.f32.mrb[17].mxu0  ;;  %v2338_v17 = vpop.f32.mrb[17].mxu1  ;;  %v1402_v36 = vmul.f32 %v1997_v13, %v1997_v13 }
 0x13d   :  { %v1327_v18 = vadd.f32 %v1326_v14, %v595_v16  ;;  %v1400_v19 = vmul.f32 %v595_v16, %v595_v16  ;;  %v1462_v20 = vadd.f32 %v1461_v12, %v1399_v11  ;;  %v1998_v21 = vpop.f32.mrb[18].mxu0  ;;  %v2340_v22 = vpop.f32.mrb[18].mxu1 }
 0x13e   :  { %v1780_v24 = vpack.c.bf16 %v1998_v21, %v1997_v13  ;;  %v598_v26 = vpop.f32.mrb[19].mxu0  ;;  %v1860_v27 = vpack.c.bf16 %v2340_v22, %v2336_v15  ;;  %v2344_v28 = vpop.f32.mrb[19].mxu1  ;;  %v1403_v39 = vmul.f32 %v1998_v21, %v1998_v21 }
 0x13f   :  { %v1463_v29 = vadd.f32 %v1462_v20, %v1400_v19  ;;  %v1775_v31 = vpack.c.bf16 %v598_v26, %v595_v16  ;;  %v1328_v32 = vadd.f32 %v1327_v18, %v598_v26  ;;  %v1401_v33 = vmul.f32 %v598_v26, %v598_v26 }
 0x140   :  { %1900 = vst [vmem:[#allocation8 + $0x48] sm:$0xff] %v1780_v24   ;;  %1916 = vst [vmem:[#allocation8 + $0xc8] sm:$0xff] %v1860_v27   ;;  %v1855_v35 = vpack.c.bf16 %v2344_v28, %v2338_v17 }
 0x141   :  { %1899 = vst [vmem:[#allocation8 + $0x40] sm:$0xff] %v1775_v31   ;;  %v1329_v37 = vadd.f32 %v1997_v13, %v1328_v32  ;;  %v1464_v38 = vadd.f32 %v1463_v29, %v1401_v33 }
 0x142   :  { %1915 = vst [vmem:[#allocation8 + $0xc0] sm:$0xff] %v1855_v35  }
 0x143   :  { %v1465_v40 = vadd.f32 %v1464_v38, %v1402_v36  ;;  %v2001_v42 = vpop.f32.mrb[20].mxu0  ;;  %v1330_v44 = vadd.f32 %v1998_v21, %v1329_v37  ;;  %v2348_v46 = vpop.f32.mrb[20].mxu1 }
 0x144   :  { %v611_v47 = vpop.f32.mrb[21].mxu0  ;;  %v2350_v48 = vpop.f32.mrb[21].mxu1  ;;  %v1406_v7 = vmul.f32 %v2001_v42, %v2001_v42 }
 0x145   :  { %v1331_v49 = vadd.f32 %v1330_v44, %v611_v47  ;;  %v1404_v52 = vmul.f32 %v611_v47, %v611_v47  ;;  %v1466_v54 = vadd.f32 %v1465_v40, %v1403_v39  ;;  %v2002_v55 = vpop.f32.mrb[22].mxu0  ;;  %v2352_v56 = vpop.f32.mrb[22].mxu1 }
 0x146   :  { %v1790_v57 = vpack.c.bf16 %v2002_v55, %v2001_v42  ;;  %v614_v59 = vpop.f32.mrb[23].mxu0  ;;  %v1870_v60 = vpack.c.bf16 %v2352_v56, %v2348_v46  ;;  %v2356_v61 = vpop.f32.mrb[23].mxu1  ;;  %v1407_v11 = vmul.f32 %v2002_v55, %v2002_v55 }
 0x147   :  { %v1467_v0 = vadd.f32 %v1466_v54, %v1404_v52  ;;  %v1785_v2 = vpack.c.bf16 %v614_v59, %v611_v47  ;;  %v1332_v3 = vadd.f32 %v1331_v49, %v614_v59  ;;  %v1405_v4 = vmul.f32 %v614_v59, %v614_v59 }
 0x148   :  { %1902 = vst [vmem:[#allocation8 + $0x58] sm:$0xff] %v1790_v57   ;;  %1918 = vst [vmem:[#allocation8 + $0xd8] sm:$0xff] %v1870_v60   ;;  %v1865_v5 = vpack.c.bf16 %v2356_v61, %v2350_v48 }
 0x149   :  { %1901 = vst [vmem:[#allocation8 + $0x50] sm:$0xff] %v1785_v2   ;;  %v1333_v8 = vadd.f32 %v2001_v42, %v1332_v3  ;;  %v1468_v9 = vadd.f32 %v1467_v0, %v1405_v4 }
 0x14a   :  { %1917 = vst [vmem:[#allocation8 + $0xd0] sm:$0xff] %v1865_v5  }
 0x14b   :  { %v1469_v12 = vadd.f32 %v1468_v9, %v1406_v7  ;;  %v2005_v13 = vpop.f32.mrb[24].mxu0  ;;  %v1334_v14 = vadd.f32 %v2002_v55, %v1333_v8  ;;  %v2360_v16 = vpop.f32.mrb[24].mxu1 }
 0x14c   :  { %v627_v18 = vpop.f32.mrb[25].mxu0  ;;  %v2362_v19 = vpop.f32.mrb[25].mxu1  ;;  %v1410_v40 = vmul.f32 %v2005_v13, %v2005_v13 }
 0x14d   :  { %v1335_v20 = vadd.f32 %v1334_v14, %v627_v18  ;;  %v1408_v21 = vmul.f32 %v627_v18, %v627_v18  ;;  %v1470_v24 = vadd.f32 %v1469_v12, %v1407_v11  ;;  %v2006_v26 = vpop.f32.mrb[26].mxu0  ;;  %v2364_v27 = vpop.f32.mrb[26].mxu1 }
 0x14e   :  { %v1800_v29 = vpack.c.bf16 %v2006_v26, %v2005_v13  ;;  %v630_v31 = vpop.f32.mrb[27].mxu0  ;;  %v1880_v32 = vpack.c.bf16 %v2364_v27, %v2360_v16  ;;  %v2368_v33 = vpop.f32.mrb[27].mxu1  ;;  %v1411_v47 = vmul.f32 %v2006_v26, %v2006_v26 }
 0x14f   :  { %v1471_v35 = vadd.f32 %v1470_v24, %v1408_v21  ;;  %v1795_v36 = vpack.c.bf16 %v630_v31, %v627_v18  ;;  %v1336_v37 = vadd.f32 %v1335_v20, %v630_v31  ;;  %v1409_v38 = vmul.f32 %v630_v31, %v630_v31 }
 0x150   :  { %1904 = vst [vmem:[#allocation8 + $0x68] sm:$0xff] %v1800_v29   ;;  %1920 = vst [vmem:[#allocation8 + $0xe8] sm:$0xff] %v1880_v32   ;;  %v1875_v39 = vpack.c.bf16 %v2368_v33, %v2362_v19  ;;  %v1416_v32 = vmul.f32 %v2290_v43, %v2290_v43 }
 0x151   :  { %1903 = vst [vmem:[#allocation8 + $0x60] sm:$0xff] %v1795_v36   ;;  %v1337_v42 = vadd.f32 %v2005_v13, %v1336_v37  ;;  %v1472_v44 = vadd.f32 %v1471_v35, %v1409_v38 }
 0x152   :  { %1919 = vst [vmem:[#allocation8 + $0xe0] sm:$0xff] %v1875_v39  }
 0x153   :  { %v1473_v49 = vadd.f32 %v1472_v44, %v1410_v40  ;;  %v2009_v52 = vpop.f32.mrb[28].mxu0  ;;  %v1338_v54 = vadd.f32 %v2006_v26, %v1337_v42  ;;  %v2372_v55 = vpop.f32.mrb[28].mxu1 }
 0x154   :  { %v643_v57 = vpop.f32.mrb[29].mxu0  ;;  %v2374_v59 = vpop.f32.mrb[29].mxu1  ;;  %v1414_v20 = vmul.f32 %v2009_v52, %v2009_v52 }
 0x155   :  { %v1339_v60 = vadd.f32 %v1338_v54, %v643_v57  ;;  %v1412_v0 = vmul.f32 %v643_v57, %v643_v57  ;;  %v1474_v2 = vadd.f32 %v1473_v49, %v1411_v47  ;;  %v2010_v3 = vpop.f32.mrb[30].mxu0  ;;  %v2376_v4 = vpop.f32.mrb[30].mxu1 }
 0x156   :  { %v1810_v5 = vpack.c.bf16 %v2010_v3, %v2009_v52  ;;  %v646_v7 = vpop.f32.mrb[31].mxu0  ;;  %v1890_v8 = vpack.c.bf16 %v2376_v4, %v2372_v55  ;;  %v2380_v9 = vpop.f32.mrb[31].mxu1  ;;  %v1415_v26 = vmul.f32 %v2010_v3, %v2010_v3 }
 0x157   :  { %v1475_v11 = vadd.f32 %v1474_v2, %v1412_v0  ;;  %v1805_v12 = vpack.c.bf16 %v646_v7, %v643_v57  ;;  %v1340_v13 = vadd.f32 %v1339_v60, %v646_v7  ;;  %v1413_v14 = vmul.f32 %v646_v7, %v646_v7 }
 0x158   :  { %1906 = vst [vmem:[#allocation8 + $0x78] sm:$0xff] %v1810_v5   ;;  %1922 = vst [vmem:[#allocation8 + $0xf8] sm:$0xff] %v1890_v8   ;;  %v1885_v18 = vpack.c.bf16 %v2380_v9, %v2374_v59 }
 0x159   :  { %1905 = vst [vmem:[#allocation8 + $0x70] sm:$0xff] %v1805_v12   ;;  %v1341_v21 = vadd.f32 %v2009_v52, %v1340_v13  ;;  %v1476_v24 = vadd.f32 %v1475_v11, %v1413_v14 }
 0x15a   :  { %1921 = vst [vmem:[#allocation8 + $0xf0] sm:$0xff] %v1885_v18  }
 0x15b   :  { %v1477_v29 = vadd.f32 %v1476_v24, %v1414_v20  ;;  %v1342_v31 = vadd.f32 %v2010_v3, %v1341_v21 }
 0x15c   :  { %2162 = shalt.err (!%p2159_p6)
}
 0x15d   :  { %s2163_s18 = scalar_lea.hbm %s2529_s2, 4096 }
 0x15e   :  { %p2164_p7 = scmp.ne.s32.totalorder %s2529_s2, %s2163_s18  ;;  %p2167_p8 = scmp.lt.u32.totalorder %s2163_s18, %s2529_s2 }
 0x160   :  { %p2169_p9 = pnand %p2167_p8, %p2164_p7 }
 0x162   :  { %2172 = shalt.err (!%p2169_p9)
}
 0x163   :  { %1530 = dma.vmem_to_hbm [thread:$0]  %s1525_s14, 4096, %s2529_s2, [#allocation5], %s2226_s25, %s2226_s25, %s2227_s26   ;;  %v1343_v35 = vadd.f32 %v1342_v31, %v2290_v43  ;;  %v1478_v36 = vadd.f32 %v1477_v29, %v1415_v26  ;;  %v1417_v39 = vmul.f32 %v2296_v50, %v2296_v50  ;;  %v1418_v40 = vmul.f32 %v2288_v41, %v2288_v41 }
 0x164   :  { %v1419_v47 = vmul.f32 %v2292_v45, %v2292_v45  ;;  %v1420_v43 = vmul.f32 %v2302_v1, %v2302_v1  ;;  %v1421_v0 = vmul.f32 %v2308_v10, %v2308_v10  ;;  %v1425_v13 = vmul.f32 %v2320_v34, %v2320_v34  ;;  %s2231_s2 = smov [#allocation9]   ;;  %s2232_s26 = smov [#allocation11]  }
 0x165   :  { %v1479_v37 = vadd.f32 %v1478_v36, %v1416_v32  ;;  %v1344_v38 = vadd.f32 %v1343_v35, %v2296_v50  ;;  %v1429_v31 = vmul.f32 %v2332_v62, %v2332_v62  ;;  %s1537_s25 = sshll.u32 %s2231_s2, 4  ;;  %s1547_s27 = sshll.u32 %s2232_s26, 4  ;;  %s1538_s25 = int_to_ptr.vmem [resolvable:$true] %s1537_s25  ;;  %s2495_s27 = int_to_ptr.vmem [resolvable:$true] %s1547_s27 }
 0x166   :  { %s2173_s28 = scalar_lea.vmem %s1538_s25, 16  ;;  %s2177_s29 = scalar_lea.vmem %s1538_s25, 32 }
 0x167   :  { %v1345_v42 = vadd.f32 %v2288_v41, %v1344_v38  ;;  %v1480_v44 = vadd.f32 %v1479_v37, %v1417_v39  ;;  %v1422_v41 = vmul.f32 %v2300_v63, %v2300_v63  ;;  %p2174_p10 = scmp.ne.s32.totalorder %s1538_s25, %s2173_s28  ;;  %p2178_p11 = scmp.lt.s32.totalorder %s1538_s25, %s1538_s25 }
 0x168   :  { %p2179_p12 = scmp.lt.s32.totalorder %s2177_s29, %s2173_s28 }
 0x169   :  { %v1481_v49 = vadd.f32 %v1480_v44, %v1418_v40  ;;  %v1346_v52 = vadd.f32 %v2292_v45, %v1345_v42  ;;  %v1423_v45 = vmul.f32 %v2304_v6, %v2304_v6  ;;  %v1433_v42 = vmul.f32 %v2344_v28, %v2344_v28 }
 0x16a   :  { %p2180_p13 = por %p2179_p12, %p2178_p11 }
 0x16b   :  { %v1347_v54 = vadd.f32 %v1346_v52, %v2302_v1  ;;  %v1482_v57 = vadd.f32 %v1481_v49, %v1419_v47  ;;  %v1424_v1 = vmul.f32 %v2314_v25, %v2314_v25 }
 0x16c   :  { %p2181_p0 = pnand %p2180_p13, %p2174_p10 }
 0x16d   :  { %v1483_v60 = vadd.f32 %v1482_v57, %v1420_v43  ;;  %v1348_v50 = vadd.f32 %v1347_v54, %v2308_v10 }
 0x16f   :  { %v1349_v2 = vadd.f32 %v2300_v63, %v1348_v50  ;;  %v1484_v3 = vadd.f32 %v1483_v60, %v1421_v0  ;;  %v1426_v63 = vmul.f32 %v2312_v23, %v2312_v23  ;;  %v1437_v60 = vmul.f32 %v2356_v61, %v2356_v61 }
 0x171   :  { %v1485_v5 = vadd.f32 %v1484_v3, %v1422_v41  ;;  %v1350_v7 = vadd.f32 %v2304_v6, %v1349_v2  ;;  %v1427_v6 = vmul.f32 %v2316_v30, %v2316_v30 }
 0x173   :  { %v1351_v8 = vadd.f32 %v1350_v7, %v2314_v25  ;;  %v1486_v11 = vadd.f32 %v1485_v5, %v1423_v45  ;;  %v1428_v25 = vmul.f32 %v2326_v53, %v2326_v53  ;;  %v1441_v7 = vmul.f32 %v2368_v33, %v2368_v33 }
 0x175   :  { %v1487_v12 = vadd.f32 %v1486_v11, %v1424_v1  ;;  %v1352_v10 = vadd.f32 %v1351_v8, %v2320_v34 }
 0x177   :  { %v1353_v14 = vadd.f32 %v2312_v23, %v1352_v10  ;;  %v1488_v18 = vadd.f32 %v1487_v12, %v1425_v13  ;;  %v1430_v23 = vmul.f32 %v2324_v51, %v2324_v51 }
 0x179   :  { %v1489_v20 = vadd.f32 %v1488_v18, %v1426_v63  ;;  %v1354_v21 = vadd.f32 %v2316_v30, %v1353_v14  ;;  %v1431_v30 = vmul.f32 %v2328_v58, %v2328_v58  ;;  %v1445_v14 = vmul.f32 %v2380_v9, %v2380_v9 }
 0x17b   :  { %v1355_v24 = vadd.f32 %v1354_v21, %v2326_v53  ;;  %v1490_v26 = vadd.f32 %v1489_v20, %v1427_v6  ;;  %v1432_v53 = vmul.f32 %v2338_v17, %v2338_v17 }
 0x17d   :  { %v1491_v29 = vadd.f32 %v1490_v26, %v1428_v25  ;;  %v1356_v34 = vadd.f32 %v1355_v24, %v2332_v62 }
 0x17f   :  { %v1357_v32 = vadd.f32 %v2324_v51, %v1356_v34  ;;  %v1492_v35 = vadd.f32 %v1491_v29, %v1429_v31  ;;  %v1434_v51 = vmul.f32 %v2336_v15, %v2336_v15 }
 0x181   :  { %v1493_v36 = vadd.f32 %v1492_v35, %v1430_v23  ;;  %v1358_v37 = vadd.f32 %v2328_v58, %v1357_v32  ;;  %v1435_v58 = vmul.f32 %v2340_v22, %v2340_v22  ;;  %v1311_v35 = vld [vmem:[#allocation9] sm:$0x1] }
 0x183   :  { %v1359_v38 = vadd.f32 %v1358_v37, %v2338_v17  ;;  %v1494_v39 = vadd.f32 %v1493_v36, %v1431_v30  ;;  %v1436_v17 = vmul.f32 %v2350_v48, %v2350_v48  ;;  %v1383_v36 = vld [vmem:[#allocation11] sm:$0x1] }
 0x185   :  { %v1495_v40 = vadd.f32 %v1494_v39, %v1432_v53  ;;  %v1360_v62 = vadd.f32 %v1359_v38, %v2344_v28 }
 0x187   :  { %v1361_v44 = vadd.f32 %v2336_v15, %v1360_v62  ;;  %v1496_v47 = vadd.f32 %v1495_v40, %v1433_v42  ;;  %v1438_v15 = vmul.f32 %v2348_v46, %v2348_v46 }
 0x189   :  { %v1497_v49 = vadd.f32 %v1496_v47, %v1434_v51  ;;  %v1362_v52 = vadd.f32 %v2340_v22, %v1361_v44  ;;  %v1439_v22 = vmul.f32 %v2352_v56, %v2352_v56 }
 0x18b   :  { %v1363_v43 = vadd.f32 %v1362_v52, %v2350_v48  ;;  %v1498_v54 = vadd.f32 %v1497_v49, %v1435_v58  ;;  %v1440_v48 = vmul.f32 %v2362_v19, %v2362_v19 }
 0x18d   :  { %v1499_v57 = vadd.f32 %v1498_v54, %v1436_v17  ;;  %v1364_v28 = vadd.f32 %v1363_v43, %v2356_v61 }
 0x18f   :  { %v1365_v50 = vadd.f32 %v2348_v46, %v1364_v28  ;;  %v1500_v0 = vadd.f32 %v1499_v57, %v1437_v60  ;;  %v1442_v46 = vmul.f32 %v2360_v16, %v2360_v16 }
 0x191   :  { %v1501_v41 = vadd.f32 %v1500_v0, %v1438_v15  ;;  %v1366_v2 = vadd.f32 %v2352_v56, %v1365_v50  ;;  %v1443_v56 = vmul.f32 %v2364_v27, %v2364_v27 }
 0x193   :  { %v1367_v3 = vadd.f32 %v1366_v2, %v2362_v19  ;;  %v1502_v45 = vadd.f32 %v1501_v41, %v1439_v22  ;;  %v1444_v19 = vmul.f32 %v2374_v59, %v2374_v59 }
 0x195   :  { %v1503_v5 = vadd.f32 %v1502_v45, %v1440_v48  ;;  %v1368_v61 = vadd.f32 %v1367_v3, %v2368_v33 }
 0x197   :  { %v1369_v1 = vadd.f32 %v2360_v16, %v1368_v61  ;;  %v1504_v8 = vadd.f32 %v1503_v5, %v1441_v7  ;;  %v1446_v16 = vmul.f32 %v2372_v55, %v2372_v55 }
 0x199   :  { %v1505_v11 = vadd.f32 %v1504_v8, %v1442_v46  ;;  %v1370_v12 = vadd.f32 %v2364_v27, %v1369_v1  ;;  %v1447_v27 = vmul.f32 %v2376_v4, %v2376_v4 }
 0x19b   :  { %v1371_v10 = vadd.f32 %v1370_v12, %v2374_v59  ;;  %v1506_v13 = vadd.f32 %v1505_v11, %v1443_v56 }
 0x19d   :  { %v1507_v63 = vadd.f32 %v1506_v13, %v1444_v19  ;;  %v1372_v33 = vadd.f32 %v1371_v10, %v2380_v9 }
 0x19f   :  { %v1373_v18 = vadd.f32 %v2372_v55, %v1372_v33  ;;  %v1508_v6 = vadd.f32 %v1507_v63, %v1445_v14 }
 0x1a1   :  { %v1374_v20 = vadd.f32 %v2376_v4, %v1373_v18  ;;  %v1509_v21 = vadd.f32 %v1508_v6, %v1446_v16 }
 0x1a3   :  { %v1375_v59 = vrot.slane %v1374_v20, 4  ;;  %v1510_v25 = vadd.f32 %v1509_v21, %v1447_v27 }
 0x1a5   :  { %v1376_v24 = vadd.f32 %v1375_v59, %v1374_v20  ;;  %v1511_v26 = vrot.slane %v1510_v25, 4 }
 0x1a7   :  { %v1377_v29 = vrot.slane %v1376_v24, 2  ;;  %v1512_v34 = vadd.f32 %v1511_v26, %v1510_v25 }
 0x1a9   :  { %v1378_v31 = vadd.f32 %v1377_v29, %v1376_v24  ;;  %v1513_v9 = vrot.slane %v1512_v34, 2 }
 0x1ab   :  { %v1514_v23 = vadd.f32 %v1513_v9, %v1512_v34  ;;  %v1379_v32 = vrot.slane %v1378_v31, 1 }
 0x1ad   :  { %v1380_v55 = vadd.f32 %v1379_v32, %v1378_v31  ;;  %v1515_v30 = vrot.slane %v1514_v23, 1 }
 0x1af   :  { %v1381_v4 = vadd.f32 %v1380_v55, %v1311_v35  ;;  %v1516_v37 = vadd.f32 %v1515_v30, %v1514_v23 }
 0x1b1   :  { %1382 = vst [vmem:[#allocation9] sm:$0x1] %v1381_v4  ;;  %v1517_v53 = vadd.f32 %v1516_v37, %v1383_v36 }
 0x1b2   :  { %2184 = shalt.err (!%p2181_p0)
}
 0x1b3   :  { %s2185_s6 = scalar_lea.hbm %s2530_s3, 16 }
 0x1b4   :  { %p2186_p1 = scmp.ne.s32.totalorder %s2530_s3, %s2185_s6  ;;  %p2189_p2 = scmp.lt.u32.totalorder %s2185_s6, %s2530_s3 }
 0x1b6   :  { %p2191_p3 = pnand %p2189_p2, %p2186_p1 }
 0x1b8   :  { %2194 = shalt.err (!%p2191_p3)
}
 0x1b9   :  { %1540 = dma.vmem_to_hbm [thread:$0]  %s1538_s25, 16, %s2530_s3, [#allocation10]   ;;  %1518 = vst [vmem:[#allocation11] sm:$0x1] %v1517_v53 }
 0x1ba   :  { %s2195_s0 = scalar_lea.vmem %s2495_s27, 16  ;;  %s2199_s13 = scalar_lea.vmem %s2495_s27, 32 }
 0x1bb   :  { %p2196_p4 = scmp.ne.s32.totalorder %s2495_s27, %s2195_s0  ;;  %p2200_p5 = scmp.lt.s32.totalorder %s2495_s27, %s2495_s27 }
 0x1bc   :  { %p2201_p6 = scmp.lt.s32.totalorder %s2199_s13, %s2195_s0 }
 0x1be   :  { %p2202_p7 = por %p2201_p6, %p2200_p5 }
 0x1c0   :  { %p2203_p8 = pnand %p2202_p7, %p2196_p4 }
 0x1c2   :  { %2206 = shalt.err (!%p2203_p8)
}
 0x1c3   :  { %s2207_s15 = scalar_lea.hbm %s2531_s4, 16 }
 0x1c4   :  { %p2208_p9 = scmp.ne.s32.totalorder %s2531_s4, %s2207_s15  ;;  %p2211_p10 = scmp.lt.u32.totalorder %s2207_s15, %s2531_s4 }
 0x1c6   :  { %p2213_p11 = pnand %p2211_p10, %p2208_p9 }
 0x1c8   :  { %2216 = shalt.err (!%p2213_p11)
}
 0x1c9   :  { %1550 = dma.vmem_to_hbm [thread:$0]  %s2495_s27, 16, %s2531_s4, [#allocation10]  }
 0x1ca   :  { %2221 = dma.done.wait [#allocation5], 4096  }
 0x1cb   :  { %2222 = vsyncadd [#allocation5], 4294963200 }
 0x1cc   :  { %2223 = dma.done.wait [#allocation10], 32  }
 0x1cd   :  { %2224 = vsyncadd [#allocation10], 4294967264 }
 0x1ce   :  { %1560 = vsyncpa [#allocation4], 1 }
 0x1cf   :  { %1561 = vsyncpa [#allocation7], 1 }
 0x1d0   :  { %1562 = vsyncpa [#allocation5], 1 }
 0x1d1   :  { %1563 = vsyncpa [#allocation10], 1 }

</bundles_post_ra>
